<compile_context>
chip_gen: v7x
topology: tpu7x:2x2x1
jax: 0.10.0
libtpu: 0.0.40
codegen_flags: <defaults>
</compile_context>

<pallas_src>
import functools

import jax
import jax.numpy as jnp
from jax.experimental import pallas as pl
from jax.experimental.pallas import tpu as pltpu

# ---- problem sizes (small, consistent with the module) ----
B = 2          # batch
S = 8          # sequence length
D_MODEL = 32   # d_model
N_HEADS = 4
HEAD_DIM = D_MODEL // N_HEADS


def mha_kernel(x_ref, wqkv_ref, wo_ref, bo_ref, o_ref, *, batch, seq, n_heads):
    # x_ref:    (B*S, D)   flattened input, resident in VMEM
    # wqkv_ref: (D, 3D)    pre-transposed fused [Wq^T | Wk^T | Wv^T]
    # wo_ref:   (D, D)     pre-transposed Wo^T
    # bo_ref:   (1, D)     final Linear bias
    # o_ref:    (B*S, D)
    bs, d = x_ref.shape
    hd = d // n_heads
    scale = hd ** (-0.5)

    # ---- fused QKV projection: one (B*S, D) x (D, 3D) MXU push ----
    qkv = jnp.dot(x_ref[...], wqkv_ref[...],
                  preferred_element_type=jnp.float32)          # (B*S, 3D)
    qkv = qkv.reshape(batch, seq, 3 * d)                        # leading split only (free)

    # ---- per-head logits (batched over B), stacked along the query axis ----
    logit_blocks = []
    v_heads = []
    for h in range(n_heads):
        lo = h * hd
        qh = qkv[:, :, lo:lo + hd]                              # (B, S, HD)
        kh = qkv[:, :, d + lo:d + lo + hd]                      # (B, S, HD)
        v_heads.append(qkv[:, :, 2 * d + lo:2 * d + lo + hd])   # (B, S, HD)
        logit_blocks.append(
            jnp.einsum("bqd,bkd->bqk", qh, kh,
                       preferred_element_type=jnp.float32))     # (B, S, S)

    # One softmax over all heads: (B, H*S, S) -> single max / exp / sum / div.
    logits = jnp.concatenate(logit_blocks, axis=1) * scale      # (B, H*S, S)
    m = jnp.max(logits, axis=-1, keepdims=True)
    p = jnp.exp(logits - m)
    attn = p / jnp.sum(p, axis=-1, keepdims=True)               # exact: rows sum to 1

    # ---- per-head context, then ONE output-projection matmul ----
    ctx_heads = []
    for h in range(n_heads):
        attn_h = attn[:, h * seq:(h + 1) * seq, :]              # sublane-aligned slice
        ctx_heads.append(
            jnp.einsum("bqk,bkd->bqd", attn_h, v_heads[h],
                       preferred_element_type=jnp.float32))     # (B, S, HD)

    ctx = jnp.concatenate(ctx_heads, axis=-1).reshape(bs, d)    # (B*S, D)
    out = jnp.dot(ctx, wo_ref[...],
                  preferred_element_type=jnp.float32) + bo_ref[...]
    o_ref[...] = out.astype(o_ref.dtype)


def multi_head_attention(x, wq, wk, wv, wo, bo):
    """x: (B, S, D); wq/wk/wv/wo: (D, D) PyTorch-layout (out, in); bo: (D,)."""
    Bx, Sx, Dx = x.shape
    assert Dx % N_HEADS == 0

    # Hoist all transposes / packing / flattening out of the kernel (once per call).
    x2 = x.reshape(Bx * Sx, Dx)                              # metadata-only in XLA
    w_qkv_t = jnp.concatenate([wq.T, wk.T, wv.T], axis=1)    # (D, 3D)
    wo_t = wo.T                                              # (D, D)
    bo2 = bo.reshape(1, Dx)                                  # (1, D)

    vmem = pl.BlockSpec(memory_space=pltpu.MemorySpace.VMEM)
    out2 = pl.pallas_call(
        functools.partial(mha_kernel, batch=Bx, seq=Sx, n_heads=N_HEADS),
        out_shape=jax.ShapeDtypeStruct((Bx * Sx, Dx), x.dtype),
        # No grid: single invocation, whole problem (~20 KiB) resident in VMEM.
        in_specs=[vmem, vmem, vmem, vmem],
        out_specs=vmem,
    )(x2, w_qkv_t, wo_t, bo2)
    return out2.reshape(Bx, Sx, Dx)


def reference_mha(x, wq, wk, wv, wo, bo):
    """Pure-JAX reference mirroring the PyTorch module (mask=None)."""
    q = x @ wq.T
    k = x @ wk.T
    v = x @ wv.T
    scale = HEAD_DIM ** (-0.5)
    outs = []
    for h in range(N_HEADS):
        sl = slice(h * HEAD_DIM, (h + 1) * HEAD_DIM)
        qh, kh, vh = q[..., sl], k[..., sl], v[..., sl]
        logits = jnp.einsum("bqd,bkd->bqk", qh, kh) * scale
        w = jax.nn.softmax(logits, axis=-1)
        outs.append(jnp.einsum("bqk,bkd->bqd", w, vh))
    concat = jnp.concatenate(outs, axis=-1)
    return concat @ wo.T + bo


if __name__ == "__main__":
    key = jax.random.PRNGKey(0)
    kx, kq, kk, kv, kwo, kbo = jax.random.split(key, 6)

    x = jax.random.normal(kx, (B, S, D_MODEL), dtype=jnp.float32)

    # Per-head (HEAD_DIM, D_MODEL) weights stacked along out-features -> (D, D),
    # same convention as the PyTorch ModuleList of per-head Linears.
    wq = jax.random.normal(kq, (D_MODEL, D_MODEL), dtype=jnp.float32) * 0.1
    wk = jax.random.normal(kk, (D_MODEL, D_MODEL), dtype=jnp.float32) * 0.1
    wv = jax.random.normal(kv, (D_MODEL, D_MODEL), dtype=jnp.float32) * 0.1
    wo = jax.random.normal(kwo, (D_MODEL, D_MODEL), dtype=jnp.float32) * 0.1
    bo = jax.random.normal(kbo, (D_MODEL,), dtype=jnp.float32) * 0.1

    out = multi_head_attention(x, wq, wk, wv, wo, bo)
    out = jax.block_until_ready(out)

    ref = reference_mha(x, wq, wk, wv, wo, bo)
    assert out.shape == (B, S, D_MODEL)
    # Exact softmax division restored -> tight tolerance again (per review).
    assert jnp.allclose(out, ref, atol=1e-4, rtol=1e-4), "mismatch vs reference"

    print("KERNEL_OK")
</pallas_src>

<mosaic_0001>
module attributes {stable_mosaic.version = 11 : i64} {
  func.func @mha_kernel(%arg0: memref<16x32xf32, #tpu.memory_space<vmem>>, %arg1: memref<32x96xf32, #tpu.memory_space<vmem>>, %arg2: memref<32x32xf32, #tpu.memory_space<vmem>>, %arg3: memref<1x32xf32, #tpu.memory_space<vmem>>, %arg4: memref<16x32xf32, #tpu.memory_space<vmem>>) attributes {dimension_semantics = [], scalar_prefetch = 0 : i64, scratch_operands = 0 : i64, tpu.core_type = #tpu.core_type<tc>} {
    %c0 = arith.constant 0 : index
    %c0_0 = arith.constant 0 : index
    %0 = vector.load %arg0[%c0, %c0_0] : memref<16x32xf32, #tpu.memory_space<vmem>>, vector<16x32xf32>
    %c0_1 = arith.constant 0 : index
    %c0_2 = arith.constant 0 : index
    %1 = vector.load %arg1[%c0_1, %c0_2] : memref<32x96xf32, #tpu.memory_space<vmem>>, vector<32x96xf32>
    %cst = arith.constant dense<0.000000e+00> : vector<16x96xf32>
    %2 = tpu.matmul %0, %1, %cst {dimension_numbers = #tpu.dot_dimension_numbers<[1], [0], [0], [1], [0, 0, 1, 1], [], []>} : vector<16x32xf32>, vector<32x96xf32>, vector<16x96xf32> -> vector<16x96xf32>
    %3 = vector.shape_cast %2 : vector<16x96xf32> to vector<2x8x96xf32>
    %4 = vector.extract_strided_slice %3 {offsets = [0, 0, 0], sizes = [2, 8, 8], strides = [1, 1, 1]} : vector<2x8x96xf32> to vector<2x8x8xf32>
    %5 = vector.extract_strided_slice %3 {offsets = [0, 0, 32], sizes = [2, 8, 8], strides = [1, 1, 1]} : vector<2x8x96xf32> to vector<2x8x8xf32>
    %6 = vector.extract_strided_slice %3 {offsets = [0, 0, 64], sizes = [2, 8, 8], strides = [1, 1, 1]} : vector<2x8x96xf32> to vector<2x8x8xf32>
    "tpu.trace_start"() <{level = 10 : i32, message = "bqd,bkd->bqk"}> : () -> ()
    %cst_3 = arith.constant dense<0.000000e+00> : vector<2x8x8xf32>
    %7 = tpu.matmul %4, %5, %cst_3 {dimension_numbers = #tpu.dot_dimension_numbers<[2], [2], [1], [1], [0, 0, 0, 1, 1, 1], [0], [0]>} : vector<2x8x8xf32>, vector<2x8x8xf32>, vector<2x8x8xf32> -> vector<2x8x8xf32>
    "tpu.trace_stop"() : () -> ()
    %8 = vector.extract_strided_slice %3 {offsets = [0, 0, 8], sizes = [2, 8, 8], strides = [1, 1, 1]} : vector<2x8x96xf32> to vector<2x8x8xf32>
    %9 = vector.extract_strided_slice %3 {offsets = [0, 0, 40], sizes = [2, 8, 8], strides = [1, 1, 1]} : vector<2x8x96xf32> to vector<2x8x8xf32>
    %10 = vector.extract_strided_slice %3 {offsets = [0, 0, 72], sizes = [2, 8, 8], strides = [1, 1, 1]} : vector<2x8x96xf32> to vector<2x8x8xf32>
    "tpu.trace_start"() <{level = 10 : i32, message = "bqd,bkd->bqk"}> : () -> ()
    %cst_4 = arith.constant dense<0.000000e+00> : vector<2x8x8xf32>
    %11 = tpu.matmul %8, %9, %cst_4 {dimension_numbers = #tpu.dot_dimension_numbers<[2], [2], [1], [1], [0, 0, 0, 1, 1, 1], [0], [0]>} : vector<2x8x8xf32>, vector<2x8x8xf32>, vector<2x8x8xf32> -> vector<2x8x8xf32>
    "tpu.trace_stop"() : () -> ()
    %12 = vector.extract_strided_slice %3 {offsets = [0, 0, 16], sizes = [2, 8, 8], strides = [1, 1, 1]} : vector<2x8x96xf32> to vector<2x8x8xf32>
    %13 = vector.extract_strided_slice %3 {offsets = [0, 0, 48], sizes = [2, 8, 8], strides = [1, 1, 1]} : vector<2x8x96xf32> to vector<2x8x8xf32>
    %14 = vector.extract_strided_slice %3 {offsets = [0, 0, 80], sizes = [2, 8, 8], strides = [1, 1, 1]} : vector<2x8x96xf32> to vector<2x8x8xf32>
    "tpu.trace_start"() <{level = 10 : i32, message = "bqd,bkd->bqk"}> : () -> ()
    %cst_5 = arith.constant dense<0.000000e+00> : vector<2x8x8xf32>
    %15 = tpu.matmul %12, %13, %cst_5 {dimension_numbers = #tpu.dot_dimension_numbers<[2], [2], [1], [1], [0, 0, 0, 1, 1, 1], [0], [0]>} : vector<2x8x8xf32>, vector<2x8x8xf32>, vector<2x8x8xf32> -> vector<2x8x8xf32>
    "tpu.trace_stop"() : () -> ()
    %16 = vector.extract_strided_slice %3 {offsets = [0, 0, 24], sizes = [2, 8, 8], strides = [1, 1, 1]} : vector<2x8x96xf32> to vector<2x8x8xf32>
    %17 = vector.extract_strided_slice %3 {offsets = [0, 0, 56], sizes = [2, 8, 8], strides = [1, 1, 1]} : vector<2x8x96xf32> to vector<2x8x8xf32>
    %18 = vector.extract_strided_slice %3 {offsets = [0, 0, 88], sizes = [2, 8, 8], strides = [1, 1, 1]} : vector<2x8x96xf32> to vector<2x8x8xf32>
    "tpu.trace_start"() <{level = 10 : i32, message = "bqd,bkd->bqk"}> : () -> ()
    %cst_6 = arith.constant dense<0.000000e+00> : vector<2x8x8xf32>
    %19 = tpu.matmul %16, %17, %cst_6 {dimension_numbers = #tpu.dot_dimension_numbers<[2], [2], [1], [1], [0, 0, 0, 1, 1, 1], [0], [0]>} : vector<2x8x8xf32>, vector<2x8x8xf32>, vector<2x8x8xf32> -> vector<2x8x8xf32>
    "tpu.trace_stop"() : () -> ()
    %20 = tpu.concatenate %7, %11, %15, %19 in 1 : vector<2x8x8xf32>, vector<2x8x8xf32>, vector<2x8x8xf32>, vector<2x8x8xf32> -> vector<2x32x8xf32>
    %cst_7 = arith.constant 0.353553385 : f32
    %21 = vector.broadcast %cst_7 : f32 to vector<2x32x8xf32>
    %22 = arith.mulf %20, %21 : vector<2x32x8xf32>
    %cst_8 = arith.constant dense<0xFF800000> : vector<2x32xf32>
    %23 = vector.multi_reduction <maximumf>, %22, %cst_8 [2] : vector<2x32x8xf32> to vector<2x32xf32>
    %24 = vector.shape_cast %23 : vector<2x32xf32> to vector<2x32x1xf32>
    %25 = vector.broadcast %24 : vector<2x32x1xf32> to vector<2x32x8xf32>
    %26 = arith.subf %22, %25 : vector<2x32x8xf32>
    %27 = math.exp %26 : vector<2x32x8xf32>
    %cst_9 = arith.constant dense<0.000000e+00> : vector<2x32xf32>
    %28 = vector.multi_reduction <add>, %27, %cst_9 [2] : vector<2x32x8xf32> to vector<2x32xf32>
    %29 = vector.shape_cast %28 : vector<2x32xf32> to vector<2x32x1xf32>
    %30 = vector.broadcast %29 : vector<2x32x1xf32> to vector<2x32x8xf32>
    %31 = arith.divf %27, %30 : vector<2x32x8xf32>
    %32 = vector.extract_strided_slice %31 {offsets = [0, 0, 0], sizes = [2, 8, 8], strides = [1, 1, 1]} : vector<2x32x8xf32> to vector<2x8x8xf32>
    "tpu.trace_start"() <{level = 10 : i32, message = "bqk,bkd->bqd"}> : () -> ()
    %cst_10 = arith.constant dense<0.000000e+00> : vector<2x8x8xf32>
    %33 = tpu.matmul %32, %6, %cst_10 {dimension_numbers = #tpu.dot_dimension_numbers<[2], [1], [1], [2], [0, 0, 0, 1, 1, 2], [0], [0]>} : vector<2x8x8xf32>, vector<2x8x8xf32>, vector<2x8x8xf32> -> vector<2x8x8xf32>
    "tpu.trace_stop"() : () -> ()
    %34 = vector.extract_strided_slice %31 {offsets = [0, 8, 0], sizes = [2, 8, 8], strides = [1, 1, 1]} : vector<2x32x8xf32> to vector<2x8x8xf32>
    "tpu.trace_start"() <{level = 10 : i32, message = "bqk,bkd->bqd"}> : () -> ()
    %cst_11 = arith.constant dense<0.000000e+00> : vector<2x8x8xf32>
    %35 = tpu.matmul %34, %10, %cst_11 {dimension_numbers = #tpu.dot_dimension_numbers<[2], [1], [1], [2], [0, 0, 0, 1, 1, 2], [0], [0]>} : vector<2x8x8xf32>, vector<2x8x8xf32>, vector<2x8x8xf32> -> vector<2x8x8xf32>
    "tpu.trace_stop"() : () -> ()
    %36 = vector.extract_strided_slice %31 {offsets = [0, 16, 0], sizes = [2, 8, 8], strides = [1, 1, 1]} : vector<2x32x8xf32> to vector<2x8x8xf32>
    "tpu.trace_start"() <{level = 10 : i32, message = "bqk,bkd->bqd"}> : () -> ()
    %cst_12 = arith.constant dense<0.000000e+00> : vector<2x8x8xf32>
    %37 = tpu.matmul %36, %14, %cst_12 {dimension_numbers = #tpu.dot_dimension_numbers<[2], [1], [1], [2], [0, 0, 0, 1, 1, 2], [0], [0]>} : vector<2x8x8xf32>, vector<2x8x8xf32>, vector<2x8x8xf32> -> vector<2x8x8xf32>
    "tpu.trace_stop"() : () -> ()
    %38 = vector.extract_strided_slice %31 {offsets = [0, 24, 0], sizes = [2, 8, 8], strides = [1, 1, 1]} : vector<2x32x8xf32> to vector<2x8x8xf32>
    "tpu.trace_start"() <{level = 10 : i32, message = "bqk,bkd->bqd"}> : () -> ()
    %cst_13 = arith.constant dense<0.000000e+00> : vector<2x8x8xf32>
    %39 = tpu.matmul %38, %18, %cst_13 {dimension_numbers = #tpu.dot_dimension_numbers<[2], [1], [1], [2], [0, 0, 0, 1, 1, 2], [0], [0]>} : vector<2x8x8xf32>, vector<2x8x8xf32>, vector<2x8x8xf32> -> vector<2x8x8xf32>
    "tpu.trace_stop"() : () -> ()
    %40 = tpu.concatenate %33, %35, %37, %39 in 2 : vector<2x8x8xf32>, vector<2x8x8xf32>, vector<2x8x8xf32>, vector<2x8x8xf32> -> vector<2x8x32xf32>
    %41 = vector.shape_cast %40 : vector<2x8x32xf32> to vector<16x32xf32>
    %c0_14 = arith.constant 0 : index
    %c0_15 = arith.constant 0 : index
    %42 = vector.load %arg2[%c0_14, %c0_15] : memref<32x32xf32, #tpu.memory_space<vmem>>, vector<32x32xf32>
    %cst_16 = arith.constant dense<0.000000e+00> : vector<16x32xf32>
    %43 = tpu.matmul %41, %42, %cst_16 {dimension_numbers = #tpu.dot_dimension_numbers<[1], [0], [0], [1], [0, 0, 1, 1], [], []>} : vector<16x32xf32>, vector<32x32xf32>, vector<16x32xf32> -> vector<16x32xf32>
    %c0_17 = arith.constant 0 : index
    %c0_18 = arith.constant 0 : index
    %44 = vector.load %arg3[%c0_17, %c0_18] : memref<1x32xf32, #tpu.memory_space<vmem>>, vector<1x32xf32>
    %45 = vector.broadcast %44 : vector<1x32xf32> to vector<16x32xf32>
    %46 = arith.addf %43, %45 : vector<16x32xf32>
    %c0_19 = arith.constant 0 : index
    %c0_20 = arith.constant 0 : index
    %47 = vector.load %arg4[%c0_19, %c0_20] : memref<16x32xf32, #tpu.memory_space<vmem>>, vector<16x32xf32>
    tpu.vector_store %arg4[%c0_19, %c0_20], %46 {strides = array<i32>} : memref<16x32xf32, #tpu.memory_space<vmem>>, vector<16x32xf32>,
    return
  }
}

</mosaic_0001>

<bundles_post_ra>
// kernel: tpu_custom_call.1
= control target key start
LH: loop header
LB: loop body
LE: loop exit
PB: predicated region body
PF: predicated region fallthrough
CT: control target
= control target key end

     0   :  { %9 = vsyncpa [#allocation3], 0  ;;  %s2210_s0 = inlined_call_operand.hbm [shape: f32[16,32], index: 0, kind: input, shape index: {}]   ;;  %s2211_s1 = inlined_call_operand.hbm [shape: f32[32,96], index: 1, kind: input, shape index: {}]   ;;  %s2212_s2 = inlined_call_operand.hbm [shape: f32[32,32], index: 2, kind: input, shape index: {}]   ;;  %s2213_s3 = inlined_call_operand.vmem [shape: f32[1,32], index: 3, kind: input, shape index: {}]   ;;  %s2214_s4 = inlined_call_operand.hbm [shape: f32[16,32], index: 4, kind: output, shape index: {}]  }
   0x1   :  { %10 = vsyncpa [#allocation6], 0 }
   0x2   :  { %11 = vsyncpa [#allocation4], 0  ;;  %s1956_s15 = smov [#allocation5]   ;;  %s1957_s17 = smov [#allocation2]  }
   0x3   :  { %s29_s16 = sshll.u32 %s1956_s15, 4  ;;  %s17_s18 = sshll.u32 %s1957_s17, 4  ;;  %s30_s16 = int_to_ptr.vmem [resolvable:$true] %s29_s16  ;;  %s2002_s18 = int_to_ptr.vmem [resolvable:$true] %s17_s18 }
   0x4   :  { %s1862_s21 = scalar_lea.hbm %s2211_s1, 512 }
   0x5   :  { %p1863_p0 = scmp.ne.s32.totalorder %s2211_s1, %s1862_s21  ;;  %p1866_p1 = scmp.lt.u32.totalorder %s1862_s21, %s2211_s1 }
   0x7   :  { %p1868_p2 = pnand %p1866_p1, %p1863_p0 }
   0x9   :  { %1871 = shalt.err (!%p1868_p2)
}
   0xa   :  { %s1872_s26 = scalar_lea.vmem %s30_s16, 512  ;;  %p1877_p4 = scmp.lt.s32.totalorder %s30_s16, %s30_s16 }
   0xb   :  { %p1873_p3 = scmp.ne.s32.totalorder %s30_s16, %s1872_s26  ;;  %p1878_p5 = scmp.lt.s32.totalorder %s1872_s26, %s1872_s26 }
   0xd   :  { %p1879_p6 = por %p1878_p5, %p1877_p4 }
   0xf   :  { %p1880_p7 = pnand %p1879_p6, %p1873_p3 }
  0x11   :  { %1883 = shalt.err (!%p1880_p7)
}
  0x12   :  { %s1958_s27 = smov 128   ;;  %s1959_s28 = smov 8  }
  0x13   :  { %35 = dma.hbm_to_vmem [thread:$0]  %s2211_s1, 512, %s30_s16, [#allocation6], %s1958_s27, %s1958_s27, %s1959_s28  }
  0x14   :  { %s1884_s7 = scalar_lea.hbm %s2210_s0, 256 }
  0x15   :  { %p1885_p8 = scmp.ne.s32.totalorder %s2210_s0, %s1884_s7  ;;  %p1888_p9 = scmp.lt.u32.totalorder %s1884_s7, %s2210_s0 }
  0x17   :  { %p1890_p10 = pnand %p1888_p9, %p1885_p8 }
  0x19   :  { %1893 = shalt.err (!%p1890_p10)
}
  0x1a   :  { %s1894_s12 = scalar_lea.vmem %s2002_s18, 256  ;;  %p1899_p12 = scmp.lt.s32.totalorder %s2002_s18, %s2002_s18 }
  0x1b   :  { %p1895_p11 = scmp.ne.s32.totalorder %s2002_s18, %s1894_s12  ;;  %p1900_p13 = scmp.lt.s32.totalorder %s1894_s12, %s1894_s12 }
  0x1d   :  { %p1901_p0 = por %p1900_p13, %p1899_p12 }
  0x1f   :  { %p1902_p1 = pnand %p1901_p0, %p1895_p11 }
  0x21   :  { %1905 = shalt.err (!%p1902_p1)
}
  0x22   :  { %23 = dma.hbm_to_vmem [thread:$0]  %s2210_s0, 256, %s2002_s18, [#allocation3], %s1958_s27, %s1958_s27, %s1959_s28  }
  0x23   :  { %s1960_s14 = smov [#allocation7]   ;;  %s1906_s19 = scalar_lea.hbm %s2212_s2, 512 }
  0x24   :  { %s41_s15 = sshll.u32 %s1960_s14, 4  ;;  %p1907_p2 = scmp.ne.s32.totalorder %s2212_s2, %s1906_s19  ;;  %s42_s15 = int_to_ptr.vmem [resolvable:$true] %s41_s15 }
  0x25   :  { %p1910_p3 = scmp.lt.u32.totalorder %s1906_s19, %s2212_s2 }
  0x27   :  { %p1912_p4 = pnand %p1910_p3, %p1907_p2 }
  0x29   :  { %1915 = shalt.err (!%p1912_p4)
}
  0x2a   :  { %s1916_s24 = scalar_lea.vmem %s42_s15, 512  ;;  %p1921_p6 = scmp.lt.s32.totalorder %s42_s15, %s42_s15 }
  0x2b   :  { %p1917_p5 = scmp.ne.s32.totalorder %s42_s15, %s1916_s24  ;;  %p1922_p7 = scmp.lt.s32.totalorder %s1916_s24, %s1916_s24 }
  0x2d   :  { %p1923_p8 = por %p1922_p7, %p1921_p6 }
  0x2f   :  { %p1924_p9 = pnand %p1923_p8, %p1917_p5 }
  0x31   :  { %1927 = shalt.err (!%p1924_p9)
}
  0x32   :  { %47 = dma.hbm_to_vmem [thread:$0]  %s2212_s2, 512, %s42_s15, [#allocation6], %s1958_s27, %s1958_s27, %s1959_s28  }
  0x33   :  { %1950 = dma.done.wait [#allocation3], 256  }
  0x34   :  { %1951 = vsyncadd [#allocation3], 4294967040 }
  0x35   :  { %1952 = dma.done.wait [#allocation6], 1024  }
  0x36   :  { %1953 = vsyncadd [#allocation6], 4294966272  ;;  %vm65_vm0 = vcmask 261120   ;;  %v61_v0 = vld [vmem:[#allocation5] sm:$0xff]  ;;  %v62_v1 = vld [vmem:[#allocation5 + $0x8] sm:$0xff]  ;;  %v1961_v8 = vmov 0.0  }
  0x37   :  { %v63_v2 = vld [vmem:[#allocation5 + $0x10] sm:$0xff]  ;;  %v1793_v3 = vpack.c.bf16 %v62_v1, %v61_v0  ;;  %v64_v4 = vld [vmem:[#allocation5 + $0x18] sm:$0xff]  ;;  %1702 = vmatprep.subr.mxu1 %v1961_v8  ;;  %vm1962_vm1 = vmmov 0   ;;  %s1963_s2 = smov 120   ;;  %s1964_s25 = smov 96   ;;  %vm150_vm2 = vcmask 64512  }
  0x38   :  { %v59_v5 = vld [vmem:[#allocation2] sm:$0xff]  ;;  %v1797_v6 = vpack.c.bf16 %v64_v4, %v63_v2  ;;  %v60_v7 = vld [vmem:[#allocation2 + $0x8] sm:$0xff]  ;;  %1704 = vmatprep.mubr.msk.f32.mxu1 %vm1962_vm1, %v1961_v8  ;;  %s1965_s26 = smov 80   ;;  %s1966_s29 = smov 88   ;;  %vm1500_vm3 = vcmask 130048   ;;  %vm1503_vm4 = vcmask 195584  }
  0x39   :  { %1699 = vmatprep.mubr.msk.f32.mxu0 %vm65_vm0, %v59_v5  ;;  %1794 = vmatprep.subr.bf16.mxu0 %v1793_v3  ;;  %s1967_s30 = smov 112   ;;  %s1968_s5 = smov 72  }
  0x3a   :  { %1796 = vmatpush3.bf16.msra.mxu0 %v1793_v3  ;;  %s1969_s6 = smov 104   ;;  %s1970_s7 = smov 64  }
  0x3b   :  { %1798 = vmatprep.subr.bf16.mxu0 %v1797_v6  ;;  %s1971_s8 = smov 56   ;;  %s1972_s9 = smov 48  }
  0x3c   :  { %s1973_s10 = smov 40   ;;  %s1974_s11 = smov 16  }
  0x3d   :  { %s1975_s12 = smov 24   ;;  %s1976_s14 = smov [#allocation8]  }
  0x3e   :  { %1800 = vmatpush3.bf16.msra.mxu0 %v1797_v6  ;;  %s1605_s15 = sshll.u32 %s1976_s14, 4  ;;  %s1606_s15 = int_to_ptr.vmem [resolvable:$true] %s1605_s15 }
  0x3f   :  { %1722 = vmatprep.subr.mxu0 %v1961_v8  ;;  %s1928_s16 = scalar_lea.vmem %s1606_s15, 256  ;;  %p1933_p11 = scmp.lt.s32.totalorder %s1606_s15, %s1606_s15 }
  0x40   :  { %p1929_p10 = scmp.ne.s32.totalorder %s1606_s15, %s1928_s16  ;;  %p1934_p12 = scmp.lt.s32.totalorder %s1928_s16, %s1928_s16 }
  0x41   :  { %1700 = vmatmul.mubr.msk.f32.vlgmr.msra.gmra.mrb[0].mxu0 %vm65_vm0, %v60_v7 }
  0x42   :  { %1724 = vmatprep.mubr.msk.f32.mxu0 %vm1962_vm1, %v1961_v8  ;;  %p1935_p13 = por %p1934_p12, %p1933_p11 }
  0x44   :  { %p1936_p0 = pnand %p1935_p13, %p1929_p10 }
 0x114   :  { %v2062_v9 = vpop.f32.mrb[0].mxu0 }
 0x115   :  { %380 = vrot.lane.b32.xlu1 %v2062_v9, %s1963_s2  ;;  %v2065_v10 = vpop.f32.mrb[1].mxu0 }
 0x116   :  { %148 = vrot.lane.b32.xlu0 %v2065_v10, %s1964_s25 }
 0x119   :  { %538 = vrot.lane.b32.xlu1 %v2062_v9, %s1965_s26 }
 0x11a   :  { %226 = vrot.lane.b32.xlu0 %v2062_v9, %s1964_s25 }
 0x11d   :  { %304 = vrot.lane.b32.xlu1 %v2065_v10, %s1966_s29 }
 0x11e   :  { %382 = vrot.lane.b32.xlu0 %v2062_v9, %s1966_s29 }
 0x121   :  { %302 = vrot.lane.b32.xlu1 %v2065_v10, %s1963_s2 }
 0x122   :  { %460 = vrot.lane.b32.xlu0 %v2065_v10, %s1965_s26 }
 0x125   :  { %536 = vrot.lane.b32.xlu1 %v2062_v9, %s1967_s30 }
 0x126   :  { %458 = vrot.lane.b32.xlu0 %v2065_v10, %s1967_s30 }
 0x129   :  { %694 = vrot.lane.b32.xlu1 %v2062_v9, %s1968_s5 }
 0x12a   :  { %616 = vrot.lane.b32.xlu0 %v2065_v10, %s1968_s5 }
 0x12d   :  { %692 = vrot.lane.b32.xlu1 %v2062_v9, %s1969_s6 }
 0x12e   :  { %614 = vrot.lane.b32.xlu0 %v2065_v10, %s1969_s6 }
 0x187   :  { %v381_v11 = vpop.permute.xlu1 %380 }
 0x188   :  { %v149_v12 = vpop.permute.xlu0 %148 }
 0x189   :  { %1703 = vmatpush3.xpose.msk.msra.mxu1 %vm150_vm2, %v149_v12 }
 0x18a   :  { %1707 = vmatprep.subr.mxu1 %v1961_v8 }
 0x18b   :  { %v539_v13 = vpop.permute.xlu1 %538 }
 0x18c   :  { %1705 = vmatmul.mubr.msk.f32.vlgmr.msra.gmra.mrb[0].mxu1 %vm150_vm2, %v2065_v10  ;;  %v227_v14 = vpop.permute.xlu0 %226 }
 0x18d   :  { %1708 = vmatpush3.xpose.msk.msra.mxu1 %vm150_vm2, %v227_v14  ;;  %1709 = vmatprep.mubr.msk.f32.mxu1 %vm1962_vm1, %v1961_v8 }
 0x18e   :  { %1712 = vmatprep.subr.mxu1 %v1961_v8 }
 0x18f   :  { %v305_v15 = vpop.permute.xlu1 %304 }
 0x190   :  { %1710 = vmatmul.mubr.msk.f32.vlgmr.msra.gmra.mrb[2].mxu1 %vm150_vm2, %v2062_v9  ;;  %v383_v16 = vpop.permute.xlu0 %382 }
 0x191   :  { %1713 = vmatpush3.xpose.msk.msra.mxu1 %vm150_vm2, %v305_v15  ;;  %1714 = vmatprep.mubr.msk.f32.mxu1 %vm1962_vm1, %v1961_v8 }
 0x192   :  { %1717 = vmatprep.subr.mxu1 %v1961_v8 }
 0x193   :  { %v303_v17 = vpop.permute.xlu1 %302 }
 0x194   :  { %1715 = vmatmul.mubr.msk.f32.vlgmr.msra.gmra.mrb[4].mxu1 %vm150_vm2, %v303_v17  ;;  %v461_v18 = vpop.permute.xlu0 %460 }
 0x195   :  { %1718 = vmatpush3.xpose.msk.msra.mxu1 %vm150_vm2, %v383_v16  ;;  %1723 = vmatpush3.xpose.msk.msra.mxu0 %vm150_vm2, %v461_v18 }
 0x196   :  { %1719 = vmatprep.mubr.msk.f32.mxu1 %vm1962_vm1, %v1961_v8  ;;  %1727 = vmatprep.subr.mxu1 %v1961_v8 }
 0x197   :  { %v537_v19 = vpop.permute.xlu1 %536  ;;  %1732 = vmatprep.subr.mxu0 %v1961_v8 }
 0x198   :  { %1720 = vmatmul.mubr.msk.f32.vlgmr.msra.gmra.mrb[6].mxu1 %vm150_vm2, %v381_v11  ;;  %v459_v20 = vpop.permute.xlu0 %458 }
 0x199   :  { %1725 = vmatmul.mubr.msk.f32.vlgmr.msra.gmra.mrb[2].mxu0 %vm150_vm2, %v459_v20  ;;  %1728 = vmatpush3.xpose.msk.msra.mxu1 %vm150_vm2, %v539_v13 }
 0x19a   :  { %1729 = vmatprep.mubr.msk.f32.mxu1 %vm1962_vm1, %v1961_v8  ;;  %1737 = vmatprep.subr.mxu1 %v1961_v8 }
 0x19b   :  { %v695_v21 = vpop.permute.xlu1 %694  ;;  %1734 = vmatprep.mubr.msk.f32.mxu0 %vm1962_vm1, %v1961_v8 }
 0x19c   :  { %1730 = vmatmul.mubr.msk.f32.vlgmr.msra.gmra.mrb[8].mxu1 %vm150_vm2, %v537_v19  ;;  %v617_v22 = vpop.permute.xlu0 %616 }
 0x19d   :  { %1733 = vmatpush3.xpose.msk.msra.mxu0 %vm150_vm2, %v617_v22  ;;  %1738 = vmatpush3.xpose.msk.msra.mxu1 %vm150_vm2, %v695_v21 }
 0x19e   :  { %1739 = vmatprep.mubr.msk.f32.mxu1 %vm1962_vm1, %v1961_v8  ;;  %1747 = vmatprep.subr.mxu1 %v1961_v8 }
 0x19f   :  { %v693_v23 = vpop.permute.xlu1 %692  ;;  %1742 = vmatprep.subr.mxu0 %v1961_v8 }
 0x1a0   :  { %1740 = vmatmul.mubr.msk.f32.vlgmr.msra.gmra.mrb[10].mxu1 %vm150_vm2, %v693_v23  ;;  %v615_v24 = vpop.permute.xlu0 %614 }
 0x1a1   :  { %1735 = vmatmul.mubr.msk.f32.vlgmr.msra.gmra.mrb[4].mxu0 %vm150_vm2, %v615_v24  ;;  %1749 = vmatprep.mubr.msk.f32.mxu1 %vm1962_vm1, %v1961_v8 }
 0x1a2   :  { %1744 = vmatprep.mubr.msk.f32.mxu0 %vm1962_vm1, %v1961_v8 }
 0x25f   :  { %v221_v25 = vpop.f32.mrb[0].mxu1 }
 0x260   :  { %v770_v26 = vmul.f32 0.35355338, %v221_v25  ;;  %v1706_v27 = vpop.f32.mrb[1].mxu1 }
 0x262   :  { %v778_v28 = vsel %vm150_vm2, %v770_v26, -inf }
 0x263   :  { %779 = vmax.xlane.f32.xlu0 %v778_v28  ;;  %v298_v29 = vpop.f32.mrb[2].mxu1 }
 0x264   :  { %v774_v30 = vmul.f32 0.35355338, %v298_v29  ;;  %v1711_v31 = vpop.f32.mrb[3].mxu1 }
 0x266   :  { %v790_v32 = vsel %vm150_vm2, %v774_v30, -inf }
 0x267   :  { %791 = vmax.xlane.f32.xlu1 %v790_v32  ;;  %v376_v33 = vpop.f32.mrb[4].mxu1 }
 0x268   :  { %v2124_v34 = vmul.f32 0.35355338, %v376_v33  ;;  %v1716_v35 = vpop.f32.mrb[5].mxu1 }
 0x26a   :  { %v781_v36 = vsel %vm150_vm2, %v2124_v34, -inf }
 0x26b   :  { %782 = vmax.xlane.f32.xlu0 %v781_v36  ;;  %v454_v37 = vpop.f32.mrb[6].mxu1 }
 0x26c   :  { %v775_v38 = vmul.f32 0.35355338, %v454_v37  ;;  %v1721_v39 = vpop.f32.mrb[7].mxu1  ;;  %v532_v40 = vpop.f32.mrb[2].mxu0 }
 0x26d   :  { %v772_v41 = vmul.f32 0.35355338, %v532_v40  ;;  %v1726_v42 = vpop.f32.mrb[3].mxu0 }
 0x26e   :  { %v793_v43 = vsel %vm150_vm2, %v775_v38, -inf }
 0x26f   :  { %794 = vmax.xlane.f32.xlu0 %v793_v43  ;;  %v610_v44 = vpop.f32.mrb[8].mxu1  ;;  %v784_v45 = vsel %vm150_vm2, %v772_v41, -inf }
 0x270   :  { %v776_v46 = vmul.f32 0.35355338, %v610_v44  ;;  %v1731_v47 = vpop.f32.mrb[9].mxu1  ;;  %785 = vmax.xlane.f32.xlu1 %v784_v45 }
 0x272   :  { %v796_v48 = vsel %vm150_vm2, %v776_v46, -inf }
 0x273   :  { %797 = vmax.xlane.f32.xlu0 %v796_v48  ;;  %v766_v49 = vpop.f32.mrb[10].mxu1 }
 0x274   :  { %v777_v50 = vmul.f32 0.35355338, %v766_v49  ;;  %v688_v51 = vpop.f32.mrb[4].mxu0  ;;  %v1741_v52 = vpop.f32.mrb[11].mxu1 }
 0x275   :  { %v773_v53 = vmul.f32 0.35355338, %v688_v51  ;;  %v1736_v54 = vpop.f32.mrb[5].mxu0 }
 0x276   :  { %v799_v55 = vsel %vm150_vm2, %v777_v50, -inf }
 0x277   :  { %800 = vmax.xlane.f32.xlu0 %v799_v55  ;;  %v787_v56 = vsel %vm150_vm2, %v773_v53, -inf }
 0x278   :  { %788 = vmax.xlane.f32.xlu1 %v787_v56 }
 0x289   :  { %866 = vrot.lane.b32.xlu1 %v2065_v10, %s1970_s7 }
 0x28d   :  { %942 = vrot.lane.b32.xlu0 %v2062_v9, %s1970_s7  ;;  %1018 = vrot.lane.b32.xlu1 %v2065_v10, %s1971_s8 }
 0x291   :  { %1170 = vrot.lane.b32.xlu0 %v2065_v10, %s1972_s9  ;;  %1094 = vrot.lane.b32.xlu1 %v2062_v9, %s1971_s8 }
 0x295   :  { %1246 = vrot.lane.b32.xlu1 %v2062_v9, %s1972_s9 }
 0x2f0   :  { %v780_v57 = vpop.xlane.xlu0 %779 }
 0x2f1   :  { %v802_v58 = vsub.f32 %v770_v26, %v780_v57 }
 0x2f3   :  { %v810_v59 = vmul.f32 1.442695, %v802_v58 }
 0x2f4   :  { %v792_v60 = vpop.xlane.xlu1 %791 }
 0x2f5   :  { %1830 = vpow2.f32 %v810_v59  ;;  %v806_v61 = vsub.f32 %v774_v30, %v792_v60 }
 0x2f7   :  { %v818_v62 = vmul.f32 1.442695, %v806_v61 }
 0x2f8   :  { %v783_v63 = vpop.xlane.xlu0 %782 }
 0x2f9   :  { %1832 = vpow2.f32 %v818_v62  ;;  %v803_v15 = vsub.f32 %v2124_v34, %v783_v63 }
 0x2fb   :  { %v812_v22 = vmul.f32 1.442695, %v803_v15  ;;  %v1508_v15 = vld [vmem:[#allocation7 + $0x10] sm:$0xff] }
 0x2fc   :  { %v795_v0 = vpop.xlane.xlu0 %794 }
 0x2fd   :  { %v807_v1 = vsub.f32 %v775_v38, %v795_v0  ;;  %v786_v2 = vpop.xlane.xlu1 %785 }
 0x2fe   :  { %v804_v3 = vsub.f32 %v772_v41, %v786_v2 }
 0x2ff   :  { %v1831_v4 = vpop.eup %1830  ;;  %v820_v5 = vmul.f32 1.442695, %v807_v1 }
 0x300   :  { %v814_v6 = vmul.f32 1.442695, %v804_v3  ;;  %v798_v7 = vpop.xlane.xlu0 %797  ;;  %v826_v11 = vsel %vm150_vm2, %v1831_v4, 0.0 }
 0x301   :  { %1834 = vpow2.f32 %v820_v5  ;;  %v808_v12 = vsub.f32 %v776_v46, %v798_v7  ;;  %827 = vadd.xlane.f32.xlu1 %v826_v11  ;;  %v1506_v11 = vld [vmem:[#allocation7] sm:$0xff] }
 0x302   :  { %1836 = vpow2.f32 %v814_v6 }
 0x303   :  { %v1833_v13 = vpop.eup %1832  ;;  %v822_v14 = vmul.f32 1.442695, %v808_v12  ;;  %v1507_v12 = vld [vmem:[#allocation7 + $0x8] sm:$0xff] }
 0x304   :  { %v801_v16 = vpop.xlane.xlu0 %800  ;;  %v838_v17 = vsel %vm150_vm2, %v1833_v13, 0.0 }
 0x305   :  { %1838 = vpow2.f32 %v822_v14  ;;  %v809_v18 = vsub.f32 %v777_v50, %v801_v16  ;;  %839 = vadd.xlane.f32.xlu0 %v838_v17  ;;  %v789_v19 = vpop.xlane.xlu1 %788  ;;  %v1509_v16 = vld [vmem:[#allocation7 + $0x18] sm:$0xff] }
 0x306   :  { %v805_v20 = vsub.f32 %v773_v53, %v789_v19  ;;  %v1805_v17 = vpack.c.bf16 %v1509_v16, %v1508_v15 }
 0x307   :  { %v824_v21 = vmul.f32 1.442695, %v809_v18 }
 0x308   :  { %v816_v23 = vmul.f32 1.442695, %v805_v20  ;;  %v943_v24 = vpop.permute.xlu0 %942 }
 0x309   :  { %1840 = vpow2.f32 %v824_v21  ;;  %v867_v25 = vpop.permute.xlu1 %866  ;;  %1748 = vmatpush3.msra.mxu1 %v943_v24 }
 0x30a   :  { %1842 = vpow2.f32 %v816_v23  ;;  %1743 = vmatpush3.msra.mxu0 %v867_v25  ;;  %1757 = vmatprep.subr.mxu1 %v1961_v8 }
 0x30b   :  { %v1835_v26 = vpop.eup %1834  ;;  %1752 = vmatprep.subr.mxu0 %v1961_v8  ;;  %1844 = vpow2.f32 %v812_v22 }
 0x30c   :  { %v2144_v27 = vpop.eup %1836  ;;  %v841_v28 = vsel %vm150_vm2, %v1835_v26, 0.0  ;;  %v1171_v41 = vpop.permute.xlu0 %1170 }
 0x30d   :  { %842 = vadd.xlane.f32.xlu0 %v841_v28  ;;  %v832_v29 = vsel %vm150_vm2, %v2144_v27, 0.0  ;;  %v1019_v38 = vpop.permute.xlu1 %1018 }
 0x30e   :  { %833 = vadd.xlane.f32.xlu1 %v832_v29 }
 0x30f   :  { %v1839_v30 = vpop.eup %1838 }
 0x310   :  { %v844_v31 = vsel %vm150_vm2, %v1839_v30, 0.0 }
 0x311   :  { %845 = vadd.xlane.f32.xlu0 %v844_v31  ;;  %v1095_v39 = vpop.permute.xlu1 %1094 }
 0x313   :  { %v1841_v32 = vpop.eup %1840 }
 0x314   :  { %v2150_v33 = vpop.eup %1842  ;;  %v847_v34 = vsel %vm150_vm2, %v1841_v32, 0.0 }
 0x315   :  { %848 = vadd.xlane.f32.xlu0 %v847_v34  ;;  %v835_v35 = vsel %vm150_vm2, %v2150_v33, 0.0  ;;  %v1845_v36 = vpop.eup %1844  ;;  %v1247_v40 = vpop.permute.xlu1 %1246 }
 0x316   :  { %836 = vadd.xlane.f32.xlu1 %v835_v35  ;;  %v829_v37 = vsel %vm150_vm2, %v1845_v36, 0.0 }
 0x31a   :  { %830 = vadd.xlane.f32.xlu1 %v829_v37 }
 0x32b   :  { %1398 = vrot.lane.b32.xlu1 %v2062_v9, %s1973_s10  ;;  %1322 = vrot.lane.b32.xlu0 %v2065_v10, %s1973_s10 }
 0x38e   :  { %v828_v42 = vpop.xlane.xlu1 %827 }
 0x38f   :  { %1846 = vrcp.f32 %v828_v42 }
 0x392   :  { %v840_v43 = vpop.xlane.xlu0 %839 }
 0x393   :  { %1848 = vrcp.f32 %v840_v43 }
 0x399   :  { %v1847_v44 = vpop.eup %1846 }
 0x39a   :  { %v851_v45 = vmul.f32 %v1847_v44, %v1831_v4  ;;  %v843_v46 = vpop.xlane.xlu0 %842 }
 0x39b   :  { %1850 = vrcp.f32 %v843_v46  ;;  %v834_v48 = vpop.xlane.xlu1 %833 }
 0x39c   :  { %1745 = vmatmul.mubr.msk.f32.vlgmr.msra.gmra.mrb[6].mxu0 %vm150_vm2, %v851_v45 }
 0x39d   :  { %v1849_v47 = vpop.eup %1848  ;;  %1753 = vmatpush3.msra.mxu0 %v1019_v38  ;;  %1754 = vmatprep.mubr.msk.f32.mxu0 %vm1962_vm1, %v1961_v8  ;;  %v1644_v38 = vld [vmem:[%s2213_s3] ss:$0 sm:$0xff] }
 0x39e   :  { %v859_v9 = vmul.f32 %v1849_v47, %v1833_v13  ;;  %v846_v10 = vpop.xlane.xlu0 %845  ;;  %1762 = vmatprep.subr.mxu0 %v1961_v8  ;;  %v1801_v13 = vpack.c.bf16 %v1507_v12, %v1506_v11 }
 0x39f   :  { %1852 = vrcp.f32 %v846_v10 }
 0x3a0   :  { %1750 = vmatmul.mubr.msk.f32.vlgmr.msra.gmra.mrb[12].mxu1 %vm150_vm2, %v859_v9 }
 0x3a1   :  { %1758 = vmatpush3.msra.mxu1 %v1095_v39  ;;  %1759 = vmatprep.mubr.msk.f32.mxu1 %vm1962_vm1, %v1961_v8 }
 0x3a2   :  { %v849_v49 = vpop.xlane.xlu0 %848  ;;  %1767 = vmatprep.subr.mxu1 %v1961_v8 }
 0x3a3   :  { %1854 = vrcp.f32 %v849_v49  ;;  %v837_v50 = vpop.xlane.xlu1 %836 }
 0x3a5   :  { %v1851_v51 = vpop.eup %1850 }
 0x3a6   :  { %v861_v52 = vmul.f32 %v1851_v51, %v1835_v26  ;;  %v1323_v0 = vpop.permute.xlu0 %1322 }
 0x3a7   :  { %v831_v53 = vpop.xlane.xlu1 %830 }
 0x3a8   :  { %1856 = vrcp.f32 %v831_v53  ;;  %1760 = vmatmul.mubr.msk.f32.vlgmr.msra.gmra.mrb[14].mxu1 %vm150_vm2, %v861_v52 }
 0x3a9   :  { %v1853_v54 = vpop.eup %1852  ;;  %1768 = vmatpush3.msra.mxu1 %v1247_v40  ;;  %1769 = vmatprep.mubr.msk.f32.mxu1 %vm1962_vm1, %v1961_v8  ;;  %1858 = vrcp.f32 %v834_v48 }
 0x3aa   :  { %v863_v55 = vmul.f32 %v1853_v54, %v1839_v30  ;;  %1777 = vmatprep.subr.mxu1 %v1961_v8  ;;  %1860 = vrcp.f32 %v837_v50 }
 0x3ab   :  { %v1399_v56 = vpop.permute.xlu1 %1398 }
 0x3ac   :  { %1770 = vmatmul.mubr.msk.f32.vlgmr.msra.gmra.mrb[16].mxu1 %vm150_vm2, %v863_v55 }
 0x3ad   :  { %v1855_v57 = vpop.eup %1854  ;;  %1778 = vmatpush3.msra.mxu1 %v1399_v56  ;;  %1779 = vmatprep.mubr.msk.f32.mxu1 %vm1962_vm1, %v1961_v8 }
 0x3ae   :  { %v865_v58 = vmul.f32 %v1855_v57, %v1841_v32 }
 0x3b0   :  { %1780 = vmatmul.mubr.msk.f32.vlgmr.msra.gmra.mrb[18].mxu1 %vm150_vm2, %v865_v58 }
 0x3b2   :  { %v1857_v59 = vpop.eup %1856 }
 0x3b3   :  { %v853_v60 = vmul.f32 %v1857_v59, %v1845_v36  ;;  %v1859_v61 = vpop.eup %1858 }
 0x3b4   :  { %v855_v62 = vmul.f32 %v1859_v61, %v2144_v27  ;;  %v1861_v63 = vpop.eup %1860 }
 0x3b5   :  { %1755 = vmatmul.mubr.msk.f32.vlgmr.msra.gmra.mrb[8].mxu0 %vm150_vm2, %v853_v60  ;;  %v857_v1 = vmul.f32 %v1861_v63, %v2150_v33 }
 0x3b6   :  { %1763 = vmatpush3.msra.mxu0 %v1171_v41  ;;  %1764 = vmatprep.mubr.msk.f32.mxu0 %vm1962_vm1, %v1961_v8 }
 0x3b7   :  { %1772 = vmatprep.subr.mxu0 %v1961_v8 }
 0x3b9   :  { %1765 = vmatmul.mubr.msk.f32.vlgmr.msra.gmra.mrb[10].mxu0 %vm150_vm2, %v855_v62 }
 0x3ba   :  { %1773 = vmatpush3.msra.mxu0 %v1323_v0  ;;  %1774 = vmatprep.mubr.msk.f32.mxu0 %vm1962_vm1, %v1961_v8 }
 0x3bb   :  { %1802 = vmatprep.subr.bf16.mxu0 %v1801_v13 }
 0x3bd   :  { %1775 = vmatmul.mubr.msk.f32.vlgmr.msra.gmra.mrb[12].mxu0 %vm150_vm2, %v857_v1 }
 0x3be   :  { %1804 = vmatpush3.bf16.msra.mxu0 %v1801_v13 }
 0x3bf   :  { %1806 = vmatprep.subr.bf16.mxu0 %v1805_v17 }
 0x3c2   :  { %1808 = vmatpush3.bf16.msra.mxu0 %v1805_v17 }
 0x46f   :  { %v938_v2 = vpop.f32.mrb[6].mxu0 }
 0x470   :  { %v1746_v3 = vpop.f32.mrb[7].mxu0 }
 0x473   :  { %v1014_v4 = vpop.f32.mrb[12].mxu1 }
 0x474   :  { %v1751_v5 = vpop.f32.mrb[13].mxu1 }
 0x47b   :  { %v1166_v6 = vpop.f32.mrb[14].mxu1 }
 0x47c   :  { %1478 = vrot.lane.b32.xlu1 %v1166_v6, %s1959_s28  ;;  %v1761_v7 = vpop.f32.mrb[15].mxu1 }
 0x47f   :  { %v1318_v14 = vpop.f32.mrb[16].mxu1 }
 0x480   :  { %1486 = vrot.lane.b32.xlu1 %v1318_v14, %s1974_s11  ;;  %v1771_v8 = vpop.f32.mrb[17].mxu1 }
 0x483   :  { %v1470_v18 = vpop.f32.mrb[18].mxu1 }
 0x484   :  { %1494 = vrot.lane.b32.xlu1 %v1470_v18, %s1975_s12  ;;  %v1781_v19 = vpop.f32.mrb[19].mxu1 }
 0x488   :  { %v1090_v20 = vpop.f32.mrb[8].mxu0 }
 0x489   :  { %v1756_v21 = vpop.f32.mrb[9].mxu0  ;;  %1476 = vrot.lane.b32.xlu0 %v1090_v20, %s1959_s28 }
 0x48c   :  { %v1242_v22 = vpop.f32.mrb[10].mxu0 }
 0x48d   :  { %1484 = vrot.lane.b32.xlu0 %v1242_v22, %s1974_s11  ;;  %v1766_v23 = vpop.f32.mrb[11].mxu0 }
 0x490   :  { %v1394_v24 = vpop.f32.mrb[12].mxu0 }
 0x491   :  { %1492 = vrot.lane.b32.xlu0 %v1394_v24, %s1975_s12  ;;  %v1776_v25 = vpop.f32.mrb[13].mxu0 }
 0x4ee   :  { %v1479_v26 = vpop.permute.xlu1 %1478 }
 0x4ef   :  { %v1499_v32 = vsel %vm150_vm2, %v1014_v4, %v1479_v26 }
 0x4f2   :  { %v1487_v28 = vpop.permute.xlu1 %1486 }
 0x4f3   :  { %v1502_v35 = vsel %vm1500_vm3, %v1499_v32, %v1487_v28 }
 0x4f6   :  { %v1495_v30 = vpop.permute.xlu1 %1494 }
 0x4f7   :  { %v1505_v37 = vsel %vm1503_vm4, %v1502_v35, %v1495_v30 }
 0x4fb   :  { %v1477_v27 = vpop.permute.xlu0 %1476 }
 0x4fc   :  { %v1498_v31 = vsel %vm150_vm2, %v938_v2, %v1477_v27 }
 0x4ff   :  { %v1485_v29 = vpop.permute.xlu0 %1484 }
 0x500   :  { %v1501_v33 = vsel %vm1500_vm3, %v1498_v31, %v1485_v29 }
 0x503   :  { %v1493_v34 = vpop.permute.xlu0 %1492 }
 0x504   :  { %v1504_v36 = vsel %vm1503_vm4, %v1501_v33, %v1493_v34 }
 0x505   :  { %1790 = vmatprep.mubr.msk.f32.mxu0 %vm65_vm0, %v1504_v36 }
 0x506   :  { %1791 = vmatmul.mubr.msk.f32.vlgmr.msra.gmra.mrb[14].mxu0 %vm65_vm0, %v1505_v37 }
 0x5d9   :  { %v1792_v39 = vpop.f32.mrb[14].mxu0 }
 0x5da   :  { %v1595_v40 = vadd.f32 %v1792_v39, %v1644_v38  ;;  %v1589_v41 = vpop.f32.mrb[15].mxu0 }
 0x5db   :  { %v1590_v42 = vadd.f32 %v1644_v38, %v1589_v41 }
 0x5dc   :  { %1599 = vst.msk [vmem:[#allocation8 + $0x8] sm:$0xff] %vm65_vm0, %v1595_v40 }
 0x5dd   :  { %1598 = vst.msk [vmem:[#allocation8] sm:$0xff] %vm65_vm0, %v1590_v42 }
 0x5de   :  { %1939 = shalt.err (!%p1936_p0)
}
 0x5df   :  { %s1940_s19 = scalar_lea.hbm %s2214_s4, 256 }
 0x5e0   :  { %p1941_p1 = scmp.ne.s32.totalorder %s2214_s4, %s1940_s19  ;;  %p1944_p2 = scmp.lt.u32.totalorder %s1940_s19, %s2214_s4 }
 0x5e2   :  { %p1946_p3 = pnand %p1944_p2, %p1941_p1 }
 0x5e4   :  { %1949 = shalt.err (!%p1946_p3)
}
 0x5e5   :  { %1611 = dma.vmem_to_hbm [thread:$0]  %s1606_s15, 256, %s2214_s4, [#allocation4], %s1958_s27, %s1958_s27, %s1959_s28  }
 0x5e6   :  { %1954 = dma.done.wait [#allocation4], 256  }
 0x5e7   :  { %1955 = vsyncadd [#allocation4], 4294967040 }
 0x5e8   :  { %1615 = vsyncpa [#allocation3], 1 }
 0x5e9   :  { %1616 = vsyncpa [#allocation6], 1 }
 0x5ea   :  { %1617 = vsyncpa [#allocation4], 1 }

</bundles_post_ra>
